<compile_context>
chip_gen: v5e
topology: v5e:2x2
jax: 0.10.0
libtpu: 0.0.40
codegen_flags: <defaults>
</compile_context>

<pallas_src>
import functools

import jax
import jax.numpy as jnp
from jax import lax
from jax.experimental import pallas as pl
from jax.experimental.pallas import tpu as pltpu

_VMEM_LIMIT = 48 * 1024 * 1024  # explicit scoped-VMEM budget (<= 64 MiB physical on v7x)


def _round_up(x, m):
    return ((x + m - 1) // m) * m


# ---------------------------------------------------------------------------
# Kernel 1: transposed conv matmul with fused per-M-tile BN statistics
#   Yt[Cp, Mp] = W[Cp, Kp] @ Xcol[Mp, Kp]^T   (bf16 in, f32 accumulate, bf16 out)
#   stats tile (Cp, 128): lane 0 = sum over M, lane 1 = sum of squares, rest 0
# ---------------------------------------------------------------------------
def _stats_slab(y):
    """y: (Cp, tm) f32 -> (Cp, 128) slab stored with a single unmasked vst."""
    s = jnp.sum(y, axis=1, keepdims=True)          # (Cp, 1)  XLU lane reduce
    sq = jnp.sum(y * y, axis=1, keepdims=True)     # (Cp, 1)
    lane = lax.broadcasted_iota(jnp.int32, (y.shape[0], 128), 1)
    return jnp.where(lane == 0, s, jnp.where(lane == 1, sq, jnp.float32(0.0)))


def _conv_stats_kernel_single_k(x_ref, w_ref, y_ref, stats_ref):
    # x_ref: (tm, K) bf16 ; w_ref: (Cp, K) bf16 ; contract K of both (MXU).
    y = lax.dot_general(w_ref[...], x_ref[...],
                        (((1,), (1,)), ((), ())),
                        preferred_element_type=jnp.float32)        # (Cp, tm)
    y_ref[...] = y.astype(y_ref.dtype)
    stats_ref[...] = _stats_slab(y)


def _conv_stats_kernel_multi_k(x_ref, w_ref, y_ref, stats_ref, acc_ref):
    k = pl.program_id(1)

    @pl.when(k == 0)
    def _():
        acc_ref[...] = jnp.zeros_like(acc_ref)

    acc_ref[...] += lax.dot_general(w_ref[...], x_ref[...],
                                    (((1,), (1,)), ((), ())),
                                    preferred_element_type=jnp.float32)

    @pl.when(k == pl.num_programs(1) - 1)
    def _():
        y = acc_ref[...]
        y_ref[...] = y.astype(y_ref.dtype)
        stats_ref[...] = _stats_slab(y)


def conv_matmul_with_stats(x_col, w_t, *, tm, tk):
    Mp, Kp = x_col.shape
    Cp, Kp2 = w_t.shape
    assert Kp == Kp2 and Mp % tm == 0
    nm = Mp // tm
    out_dtype = jnp.bfloat16   # halve Y writeback; BN stats stay f32 in-kernel

    out_shape = (jax.ShapeDtypeStruct((Cp, Mp), out_dtype),
                 jax.ShapeDtypeStruct((Cp, nm * 128), jnp.float32))

    if Kp == tk:
        # single K step: no accumulator, no zero-init, K not padded.
        return pl.pallas_call(
            _conv_stats_kernel_single_k,
            out_shape=out_shape,
            grid_spec=pltpu.PrefetchScalarGridSpec(
                num_scalar_prefetch=0,
                grid=(nm,),
                in_specs=[pl.BlockSpec((tm, Kp), lambda i: (i, 0)),
                          pl.BlockSpec((Cp, Kp), lambda i: (0, 0))],
                out_specs=[pl.BlockSpec((Cp, tm), lambda i: (0, i)),
                           pl.BlockSpec((Cp, 128), lambda i: (0, i))],
            ),
            compiler_params=pltpu.CompilerParams(
                dimension_semantics=("parallel",),
                vmem_limit_bytes=_VMEM_LIMIT),
        )(x_col, w_t)

    assert Kp % tk == 0
    nk = Kp // tk
    return pl.pallas_call(
        _conv_stats_kernel_multi_k,
        out_shape=out_shape,
        grid_spec=pltpu.PrefetchScalarGridSpec(
            num_scalar_prefetch=0,
            grid=(nm, nk),
            in_specs=[pl.BlockSpec((tm, tk), lambda i, k: (i, k)),
                      pl.BlockSpec((Cp, tk), lambda i, k: (0, k))],
            out_specs=[pl.BlockSpec((Cp, tm), lambda i, k: (0, i)),
                       pl.BlockSpec((Cp, 128), lambda i, k: (0, i))],
            scratch_shapes=[pltpu.VMEM((Cp, tm), jnp.float32)],
        ),
        compiler_params=pltpu.CompilerParams(
            dimension_semantics=("parallel", "arbitrary"),
            vmem_limit_bytes=_VMEM_LIMIT),
    )(x_col, w_t)


# ---------------------------------------------------------------------------
# Kernel 2: fused BN affine (+ optional LeakyReLU, slope 0.01), in place on Yt
# ---------------------------------------------------------------------------
def _affine_act_kernel(y_ref, scale_ref, shift_ref, o_ref, *, relu):
    z = y_ref[...].astype(jnp.float32) * scale_ref[...] + shift_ref[...]
    if relu:
        z = jnp.where(z >= 0, z, 0.01 * z)
    o_ref[...] = z.astype(o_ref.dtype)


def bn_affine_act(yt, scale, shift, *, relu):
    Cp, Mp = yt.shape
    # largest lane-dense row tile that divides Mp (decoupled from the matmul tm)
    tma = 128
    for cand in (16384, 8192, 4096, 2048, 1024, 512, 256, 128):
        if Mp % cand == 0:
            tma = cand
            break
    return pl.pallas_call(
        functools.partial(_affine_act_kernel, relu=relu),
        out_shape=jax.ShapeDtypeStruct((Cp, Mp), yt.dtype),
        grid_spec=pltpu.PrefetchScalarGridSpec(
            num_scalar_prefetch=0,
            grid=(Mp // tma,),
            in_specs=[pl.BlockSpec((Cp, tma), lambda i: (0, i)),
                      pl.BlockSpec((Cp, 1), lambda i: (0, 0)),
                      pl.BlockSpec((Cp, 1), lambda i: (0, 0))],
            out_specs=pl.BlockSpec((Cp, tma), lambda i: (0, i)),
        ),
        input_output_aliases={0: 0},        # update Yt in place, no 2nd HBM buffer
        compiler_params=pltpu.CompilerParams(
            dimension_semantics=("parallel",),
            vmem_limit_bytes=_VMEM_LIMIT),
    )(yt, scale, shift)


# ---------------------------------------------------------------------------
# Glue: NHWC im2col (K ordered kh, kw, Cin; weight is re-ordered to match)
# ---------------------------------------------------------------------------
def _im2col_nhwc(x_nchw, kh, kw, stride, padding, dtype):
    N, C, H, W = x_nchw.shape
    x = jnp.transpose(x_nchw, (0, 2, 3, 1)).astype(dtype)          # NHWC + cast once
    x = jnp.pad(x, ((0, 0), (padding, padding), (padding, padding), (0, 0)))
    Ho = (H + 2 * padding - kh) // stride + 1
    Wo = (W + 2 * padding - kw) // stride + 1
    slabs = []
    for ki in range(kh):
        for kj in range(kw):
            slabs.append(x[:, ki:ki + stride * Ho:stride,
                           kj:kj + stride * Wo:stride, :])          # (N,Ho,Wo,C)
    xc = jnp.concatenate(slabs, axis=-1)                            # lane-axis concat
    # TODO(synk): fuse im2col into the matmul kernel (kh*kw grid axis / manual
    #             DMA of halo'd rows) to avoid this kh*kw HBM duplication.
    return xc.reshape(N * Ho * Wo, kh * kw * C), (N, Ho, Wo)


@functools.partial(
    jax.jit,
    static_argnames=("stride", "padding", "bn", "relu", "eps",
                     "tm", "tk", "max_single_k"))
def _basic_conv_forward(x_nchw, conv_weight, gamma, beta, *,
                        stride, padding, bn, relu, eps,
                        tm, tk, max_single_k):
    """Equivalent of BasicConv.forward (Conv2d bias=False, BN in training mode)."""
    Cout, Cin, kh, kw = conv_weight.shape
    compute_dtype = jnp.bfloat16   # MXU inputs / Y intermediate; BN math in f32
    x_col, (N, Ho, Wo) = _im2col_nhwc(x_nchw, kh, kw, stride, padding, compute_dtype)
    M, K = x_col.shape

    # M rides the lane axis of Yt: tiles must be multiples of 128 lanes.
    # (On v7x keep tm small enough that nm >= 2 for large M so both TCs get work.)
    tm = max(128, (tm // 128) * 128)
    tm = min(tm, _round_up(M, 128))
    Mp = _round_up(M, tm)
    # Cout rides the sublane axis: pad only to the bf16 sublane pack (16), not 128.
    Cp = _round_up(Cout, 16)

    if K <= max_single_k:
        tk_eff, Kp = K, K                    # full-extent K block: no zero inflation
    else:
        tk_eff = max(128, (tk // 128) * 128)
        Kp = _round_up(K, tk_eff)

    # zero padding is inert for both the matmul and the BN sums.
    x_col_p = jnp.pad(x_col, ((0, Mp - M), (0, Kp - K)))
    w_t = jnp.transpose(conv_weight, (0, 2, 3, 1)).reshape(Cout, K)
    w_t = jnp.pad(w_t.astype(compute_dtype), ((0, Cp - Cout), (0, Kp - K)))

    yt, stats = conv_matmul_with_stats(x_col_p, w_t, tm=tm, tk=tk_eff)

    if bn:
        stats = stats.reshape(Cp, Mp // tm, 128)
        col_sum = jnp.sum(stats[:, :, 0], axis=1)
        col_sq = jnp.sum(stats[:, :, 1], axis=1)
        mean = col_sum / M
        # TODO(synk): E[y^2]-E[y]^2 can cancel when |mean| >> std; use a shifted
        #             or two-pass variance for accuracy-critical uses.
        var = jnp.maximum(col_sq / M - mean * mean, 0.0)   # biased var (PyTorch BN)
        gamma_p = jnp.pad(gamma.astype(jnp.float32), (0, Cp - Cout))
        beta_p = jnp.pad(beta.astype(jnp.float32), (0, Cp - Cout))
        scale = gamma_p * lax.rsqrt(var + eps)
        shift = beta_p - mean * scale
        # TODO(synk): running_mean / running_var buffer updates are not tracked.
    else:
        scale = jnp.ones((Cp,), jnp.float32)
        shift = jnp.zeros((Cp,), jnp.float32)

    if bn or relu:
        yt = bn_affine_act(yt, scale.reshape(Cp, 1), shift.reshape(Cp, 1), relu=relu)

    out = yt[:Cout, :M].astype(jnp.float32).reshape(Cout, N, Ho, Wo)
    # TODO(synk): skip this transpose if the downstream consumer accepts NHWC/CNHW.
    return jnp.transpose(out, (1, 0, 2, 3))                         # NCHW


def basic_conv_forward(x, conv_weight, gamma, beta, *,
                       stride=1, padding=1, bn=True, relu=True, eps=1e-5,
                       tm=1024, tk=512, max_single_k=2048):
    return _basic_conv_forward(x, conv_weight, gamma, beta,
                               stride=stride, padding=padding, bn=bn, relu=relu,
                               eps=eps, tm=tm, tk=tk, max_single_k=max_single_k)


# ---------------------------------------------------------------------------
# Pure-JAX f32 reference of the PyTorch module (for sanity checking)
# ---------------------------------------------------------------------------
def _reference(x, w, gamma, beta, *, stride=1, padding=1, eps=1e-5):
    y = lax.conv_general_dilated(
        x, w, window_strides=(stride, stride),
        padding=((padding, padding), (padding, padding)),
        dimension_numbers=("NCHW", "OIHW", "NCHW"),
        precision=lax.Precision.HIGHEST)
    mean = jnp.mean(y, axis=(0, 2, 3), keepdims=True)
    var = jnp.mean((y - mean) ** 2, axis=(0, 2, 3), keepdims=True)
    y = (y - mean) / jnp.sqrt(var + eps) * gamma.reshape(1, -1, 1, 1) \
        + beta.reshape(1, -1, 1, 1)
    return jnp.where(y >= 0, y, 0.01 * y)


def _max_rel_err(out, ref):
    return float(jnp.max(jnp.abs(out - ref) / (1.0 + jnp.abs(ref))))


if __name__ == "__main__":
    key = jax.random.PRNGKey(0)
    k_x, k_w = jax.random.split(key)

    # Config 1: BasicConv(4, 8, kernel_size=3, stride=1, padding=1)
    N, Cin, H, W = 2, 4, 16, 16
    Cout, kh, kw = 8, 3, 3
    x = jax.random.normal(k_x, (N, Cin, H, W), dtype=jnp.float32)
    conv_weight = jax.random.normal(k_w, (Cout, Cin, kh, kw), dtype=jnp.float32) * 0.1
    gamma = jnp.ones((Cout,), jnp.float32)   # BatchNorm2d default weight init
    beta = jnp.zeros((Cout,), jnp.float32)   # BatchNorm2d default bias init

    out = basic_conv_forward(x, conv_weight, gamma, beta,
                             stride=1, padding=1, bn=True, relu=True)
    out = jax.block_until_ready(out)
    assert out.shape == (N, Cout, H, W)
    err = _max_rel_err(out, _reference(x, conv_weight, gamma, beta))
    # bf16 MXU inputs + bf16 Y intermediate bound the accuracy (see notes).
    assert err < 5e-2, f"config1 max rel error vs reference: {err}"

    # Config 2: stride-2 conv, Cout not a multiple of 16, K=144 -> exercises the
    # multi-K accumulator path (nk=2), multi-M-tile stats (nm=4) and Cp padding.
    N2, Cin2, H2, W2, Cout2 = 2, 16, 32, 32, 24
    x2 = jax.random.normal(jax.random.PRNGKey(1), (N2, Cin2, H2, W2), jnp.float32)
    w2 = jax.random.normal(jax.random.PRNGKey(2), (Cout2, Cin2, 3, 3), jnp.float32) * 0.1
    g2 = jnp.ones((Cout2,), jnp.float32)
    b2 = jnp.zeros((Cout2,), jnp.float32)
    out2 = basic_conv_forward(x2, w2, g2, b2, stride=2, padding=1,
                              bn=True, relu=True, tm=128, tk=128, max_single_k=128)
    out2 = jax.block_until_ready(out2)
    assert out2.shape == (N2, Cout2, 16, 16)
    err2 = _max_rel_err(out2, _reference(x2, w2, g2, b2, stride=2, padding=1))
    assert err2 < 5e-2, f"config2 max rel error vs reference: {err2}"

    print("KERNEL_OK")
</pallas_src>

<mosaic_0001>
module attributes {stable_mosaic.version = 11 : i64} {
  func.func @_conv_stats_kernel_single_k(%arg0: i32, %arg1: memref<512x36xbf16, #tpu.memory_space<vmem>>, %arg2: memref<16x36xbf16, #tpu.memory_space<vmem>>, %arg3: memref<16x512xbf16, #tpu.memory_space<vmem>>, %arg4: memref<16x128xf32, #tpu.memory_space<vmem>>) attributes {dimension_semantics = [#tpu.dimension_semantics<parallel>], iteration_bounds = array<i64: 1>, scalar_prefetch = 0 : i64, scratch_operands = 0 : i64, tpu.core_type = #tpu.core_type<tc>, window_params = [{transform_indices = @transform_0, window_bounds = array<i64: 512, 36>}, {pipeline_mode = #tpu.pipeline_mode<synchronous>, transform_indices = @transform_1, window_bounds = array<i64: 16, 36>}, {transform_indices = @transform_2, window_bounds = array<i64: 16, 512>}, {transform_indices = @transform_3, window_bounds = array<i64: 16, 128>}]} {
    %c0 = arith.constant 0 : index
    %c0_0 = arith.constant 0 : index
    %0 = vector.load %arg2[%c0, %c0_0] : memref<16x36xbf16, #tpu.memory_space<vmem>>, vector<16x36xbf16>
    %c0_1 = arith.constant 0 : index
    %c0_2 = arith.constant 0 : index
    %1 = vector.load %arg1[%c0_1, %c0_2] : memref<512x36xbf16, #tpu.memory_space<vmem>>, vector<512x36xbf16>
    %cst = arith.constant dense<0.000000e+00> : vector<16x512xf32>
    %2 = tpu.matmul %0, %1, %cst {dimension_numbers = #tpu.dot_dimension_numbers<[1], [1], [0], [0], [0, 0, 1, 0], [], []>} : vector<16x36xbf16>, vector<512x36xbf16>, vector<16x512xf32> -> vector<16x512xf32>
    %3 = arith.truncf %2 : vector<16x512xf32> to vector<16x512xbf16>
    %c0_3 = arith.constant 0 : index
    %c0_4 = arith.constant 0 : index
    %4 = vector.load %arg3[%c0_3, %c0_4] : memref<16x512xbf16, #tpu.memory_space<vmem>>, vector<16x512xbf16>
    tpu.vector_store %arg3[%c0_3, %c0_4], %3 {strides = array<i32>} : memref<16x512xbf16, #tpu.memory_space<vmem>>, vector<16x512xbf16>,
    %cst_5 = arith.constant dense<0.000000e+00> : vector<16xf32>
    %5 = vector.multi_reduction <add>, %2, %cst_5 [1] : vector<16x512xf32> to vector<16xf32>
    %6 = vector.shape_cast %5 : vector<16xf32> to vector<16x1xf32>
    %7 = arith.mulf %2, %2 : vector<16x512xf32>
    %cst_6 = arith.constant dense<0.000000e+00> : vector<16xf32>
    %8 = vector.multi_reduction <add>, %7, %cst_6 [1] : vector<16x512xf32> to vector<16xf32>
    %9 = vector.shape_cast %8 : vector<16xf32> to vector<16x1xf32>
    %10 = tpu.iota {dimensions = array<i32: 1>} : vector<16x128xi32>
    %c0_i32 = arith.constant 0 : i32
    %11 = vector.broadcast %c0_i32 : i32 to vector<16x128xi32>
    %12 = arith.cmpi eq, %10, %11 : vector<16x128xi32>
    %c1_i32 = arith.constant 1 : i32
    %13 = vector.broadcast %c1_i32 : i32 to vector<16x128xi32>
    %14 = arith.cmpi eq, %10, %13 : vector<16x128xi32>
    %cst_7 = arith.constant 0.000000e+00 : f32
    %15 = vector.shape_cast %9 : vector<16x1xf32> to vector<16x1xf32>
    %16 = vector.broadcast %15 : vector<16x1xf32> to vector<16x128xf32>
    %17 = vector.broadcast %cst_7 : f32 to vector<16x128xf32>
    %18 = arith.select %14, %16, %17 : vector<16x128xi1>, vector<16x128xf32>
    %19 = vector.shape_cast %6 : vector<16x1xf32> to vector<16x1xf32>
    %20 = vector.broadcast %19 : vector<16x1xf32> to vector<16x128xf32>
    %21 = arith.select %12, %20, %18 : vector<16x128xi1>, vector<16x128xf32>
    %c0_8 = arith.constant 0 : index
    %c0_9 = arith.constant 0 : index
    %22 = vector.load %arg4[%c0_8, %c0_9] : memref<16x128xf32, #tpu.memory_space<vmem>>, vector<16x128xf32>
    tpu.vector_store %arg4[%c0_8, %c0_9], %21 {strides = array<i32>} : memref<16x128xf32, #tpu.memory_space<vmem>>, vector<16x128xf32>,
    return
  }
  func.func @transform_0(%arg0: i32) -> (i32, i32) {
    %c0_i32 = arith.constant 0 : i32
    %c0_i32_0 = arith.constant 0 : i32
    return %arg0, %c0_i32 : i32, i32
  }
  func.func @transform_1(%arg0: i32) -> (i32, i32) {
    %c0_i32 = arith.constant 0 : i32
    %c0_i32_0 = arith.constant 0 : i32
    %c0_i32_1 = arith.constant 0 : i32
    return %c0_i32, %c0_i32_0 : i32, i32
  }
  func.func @transform_2(%arg0: i32) -> (i32, i32) {
    %c0_i32 = arith.constant 0 : i32
    %c0_i32_0 = arith.constant 0 : i32
    return %c0_i32, %arg0 : i32, i32
  }
  func.func @transform_3(%arg0: i32) -> (i32, i32) {
    %c0_i32 = arith.constant 0 : i32
    %c0_i32_0 = arith.constant 0 : i32
    return %c0_i32, %arg0 : i32, i32
  }
}

module attributes {stable_mosaic.version = 11 : i64} {
  func.func @_affine_act_kernel(%arg0: i32, %arg1: memref<16x512xbf16, #tpu.memory_space<vmem>>, %arg2: memref<16x1xf32, #tpu.memory_space<vmem>>, %arg3: memref<16x1xf32, #tpu.memory_space<vmem>>, %arg4: memref<16x512xbf16, #tpu.memory_space<vmem>>) attributes {dimension_semantics = [#tpu.dimension_semantics<parallel>], iteration_bounds = array<i64: 1>, scalar_prefetch = 0 : i64, scratch_operands = 0 : i64, tpu.core_type = #tpu.core_type<tc>, window_params = [{transform_indices = @transform_0, window_bounds = array<i64: 16, 512>}, {pipeline_mode = #tpu.pipeline_mode<synchronous>, transform_indices = @transform_1, window_bounds = array<i64: 16, 1>}, {pipeline_mode = #tpu.pipeline_mode<synchronous>, transform_indices = @transform_2, window_bounds = array<i64: 16, 1>}, {transform_indices = @transform_3, window_bounds = array<i64: 16, 512>}]} {
    %c0 = arith.constant 0 : index
    %c0_0 = arith.constant 0 : index
    %0 = vector.load %arg1[%c0, %c0_0] : memref<16x512xbf16, #tpu.memory_space<vmem>>, vector<16x512xbf16>
    %1 = arith.extf %0 : vector<16x512xbf16> to vector<16x512xf32>
    %c0_1 = arith.constant 0 : index
    %c0_2 = arith.constant 0 : index
    %2 = vector.load %arg2[%c0_1, %c0_2] : memref<16x1xf32, #tpu.memory_space<vmem>>, vector<16x1xf32>
    %3 = vector.broadcast %2 : vector<16x1xf32> to vector<16x512xf32>
    %4 = arith.mulf %1, %3 : vector<16x512xf32>
    %c0_3 = arith.constant 0 : index
    %c0_4 = arith.constant 0 : index
    %5 = vector.load %arg3[%c0_3, %c0_4] : memref<16x1xf32, #tpu.memory_space<vmem>>, vector<16x1xf32>
    %6 = vector.broadcast %5 : vector<16x1xf32> to vector<16x512xf32>
    %7 = arith.addf %4, %6 : vector<16x512xf32>
    %cst = arith.constant 0.000000e+00 : f32
    %8 = vector.broadcast %cst : f32 to vector<16x512xf32>
    %9 = arith.cmpf oge, %7, %8 : vector<16x512xf32>
    %cst_5 = arith.constant 0.00999999977 : f32
    %10 = vector.broadcast %cst_5 : f32 to vector<16x512xf32>
    %11 = arith.mulf %10, %7 : vector<16x512xf32>
    %12 = arith.select %9, %7, %11 : vector<16x512xi1>, vector<16x512xf32>
    %13 = arith.truncf %12 : vector<16x512xf32> to vector<16x512xbf16>
    %c0_6 = arith.constant 0 : index
    %c0_7 = arith.constant 0 : index
    %14 = vector.load %arg4[%c0_6, %c0_7] : memref<16x512xbf16, #tpu.memory_space<vmem>>, vector<16x512xbf16>
    tpu.vector_store %arg4[%c0_6, %c0_7], %13 {strides = array<i32>} : memref<16x512xbf16, #tpu.memory_space<vmem>>, vector<16x512xbf16>,
    return
  }
  func.func @transform_0(%arg0: i32) -> (i32, i32) {
    %c0_i32 = arith.constant 0 : i32
    %c0_i32_0 = arith.constant 0 : i32
    return %c0_i32, %arg0 : i32, i32
  }
  func.func @transform_1(%arg0: i32) -> (i32, i32) {
    %c0_i32 = arith.constant 0 : i32
    %c0_i32_0 = arith.constant 0 : i32
    %c0_i32_1 = arith.constant 0 : i32
    return %c0_i32, %c0_i32_0 : i32, i32
  }
  func.func @transform_2(%arg0: i32) -> (i32, i32) {
    %c0_i32 = arith.constant 0 : i32
    %c0_i32_0 = arith.constant 0 : i32
    %c0_i32_1 = arith.constant 0 : i32
    return %c0_i32, %c0_i32_0 : i32, i32
  }
  func.func @transform_3(%arg0: i32) -> (i32, i32) {
    %c0_i32 = arith.constant 0 : i32
    %c0_i32_0 = arith.constant 0 : i32
    return %c0_i32, %arg0 : i32, i32
  }
}

</mosaic_0001>

<bundles_post_ra>
// kernel: _basic_conv_forward.3
= control target key start
LH: loop header
LB: loop body
LE: loop exit
PB: predicated region body
PF: predicated region fallthrough
CT: control target
= control target key end

     0   :  { %v105_v0 = vmov 0   ;;  %s162_s2 = inlined_call_operand.vmem [shape: f32[16,1], index: 2, kind: input, shape index: {}]   ;;  %s163_s1 = inlined_call_operand.vmem [shape: f32[16,1], index: 1, kind: input, shape index: {}]   ;;  %s164_s0 = inlined_call_operand.vmem [shape: bf16[16,512], index: 0, kind: input, shape index: {}, may-alias: {0,3}]   ;;  %s165_s3 = inlined_call_operand.vmem [shape: bf16[16,512], index: 3, kind: output, shape index: {}, may-alias: {0,3}]  }
   0x1   :  { %104 = vset.pattern.permute.xlu1 %v105_v0  ;;  %103 = vset.pattern.permute.xlu0 %v105_v0  ;;  %v46_v1 = vld [vmem:[%s162_s2] sm:$0xff]  ;;  %v47_v3 = vld [vmem:[%s162_s2 + $0x8] sm:$0xff]  ;;  %v16_v17 = vld [vmem:[%s164_s0 + $0x10] sm:$0xff] }
   0x2   :  { %v26_v2 = vld [vmem:[%s163_s1] sm:$0xff]  ;;  %50 = vperm.xlu1 %104, %v46_v1   ;;  %v27_v4 = vld [vmem:[%s163_s1 + $0x8] sm:$0xff]  ;;  %v17_v18 = vld [vmem:[%s164_s0 + $0x18] sm:$0xff]  ;;  %v22_v23 = vunpack.c.l.bf16 %v16_v17  ;;  %v23_v24 = vunpack.c.h.bf16 %v16_v17 }
   0x3   :  { %30 = vperm.xlu0 %103, %v26_v2   ;;  %v14_v5 = vld [vmem:[%s164_s0] sm:$0xff]  ;;  %v15_v6 = vld [vmem:[%s164_s0 + $0x8] sm:$0xff]  ;;  %v24_v25 = vunpack.c.l.bf16 %v17_v18  ;;  %v25_v29 = vunpack.c.h.bf16 %v17_v18 }
   0x4   :  { %v18_v7 = vunpack.c.l.bf16 %v14_v5  ;;  %v19_v8 = vunpack.c.h.bf16 %v14_v5  ;;  %v20_v9 = vunpack.c.l.bf16 %v15_v6  ;;  %v21_v10 = vunpack.c.h.bf16 %v15_v6 }
   0xa   :  { %55 = vperm.xlu1 %104, %v47_v3  }
   0xb   :  { %35 = vperm.xlu0 %103, %v27_v4  }
  0x74   :  { %v51_v11 = vpop.permute.xlu1 %50 }
  0x75   :  { %v31_v12 = vpop.permute.xlu0 %30 }
  0x76   :  { %v38_v13 = vmul.f32 %v31_v12, %v18_v7  ;;  %v39_v14 = vmul.f32 %v31_v12, %v19_v8  ;;  %v40_v15 = vmul.f32 %v31_v12, %v20_v9  ;;  %v41_v16 = vmul.f32 %v31_v12, %v21_v10 }
  0x78   :  { %v58_v19 = vadd.f32 %v51_v11, %v38_v13  ;;  %v59_v20 = vadd.f32 %v51_v11, %v39_v14  ;;  %v60_v21 = vadd.f32 %v51_v11, %v40_v15  ;;  %v61_v22 = vadd.f32 %v51_v11, %v41_v16 }
  0x7a   :  { %vm66_vm0 = vcmp.ge.f32.partialorder %v58_v19, 0.0  ;;  %vm67_vm1 = vcmp.ge.f32.partialorder %v59_v20, 0.0  ;;  %vm68_vm2 = vcmp.ge.f32.partialorder %v60_v21, 0.0  ;;  %vm69_vm3 = vcmp.ge.f32.partialorder %v61_v22, 0.0 }
  0x7b   :  { %v74_v26 = vmul.f32 0.01, %v58_v19  ;;  %v75_v27 = vmul.f32 0.01, %v59_v20  ;;  %v76_v28 = vmul.f32 0.01, %v60_v21 }
  0x7c   :  { %v77_v30 = vmul.f32 0.01, %v61_v22  ;;  %v56_v40 = vpop.permute.xlu1 %55 }
  0x7d   :  { %v82_v31 = vsel %vm66_vm0, %v58_v19, %v74_v26  ;;  %v83_v32 = vsel %vm67_vm1, %v59_v20, %v75_v27  ;;  %v84_v33 = vsel %vm68_vm2, %v60_v21, %v76_v28  ;;  %v36_v34 = vpop.permute.xlu0 %35 }
  0x7e   :  { %v85_v35 = vsel %vm69_vm3, %v61_v22, %v77_v30  ;;  %v90_v36 = vpack.c.bf16 %v83_v32, %v82_v31  ;;  %v42_v37 = vmul.f32 %v36_v34, %v22_v23  ;;  %v43_v38 = vmul.f32 %v36_v34, %v23_v24 }
  0x7f   :  { %v91_v39 = vpack.c.bf16 %v85_v35, %v84_v33  ;;  %v44_v41 = vmul.f32 %v36_v34, %v24_v25  ;;  %v45_v42 = vmul.f32 %v36_v34, %v25_v29 }
  0x80   :  { %94 = vst [vmem:[%s165_s3] sm:$0xff] %v90_v36  ;;  %v62_v43 = vadd.f32 %v56_v40, %v42_v37  ;;  %v63_v44 = vadd.f32 %v56_v40, %v43_v38 }
  0x81   :  { %95 = vst [vmem:[%s165_s3 + $0x8] sm:$0xff] %v91_v39  ;;  %v64_v45 = vadd.f32 %v56_v40, %v44_v41  ;;  %v65_v46 = vadd.f32 %v56_v40, %v45_v42 }
  0x82   :  { %vm70_vm4 = vcmp.ge.f32.partialorder %v62_v43, 0.0  ;;  %vm71_vm5 = vcmp.ge.f32.partialorder %v63_v44, 0.0  ;;  %v78_v47 = vmul.f32 0.01, %v62_v43  ;;  %v79_v48 = vmul.f32 0.01, %v63_v44 }
  0x83   :  { %vm72_vm6 = vcmp.ge.f32.partialorder %v64_v45, 0.0  ;;  %vm73_vm7 = vcmp.ge.f32.partialorder %v65_v46, 0.0  ;;  %v80_v49 = vmul.f32 0.01, %v64_v45  ;;  %v81_v50 = vmul.f32 0.01, %v65_v46 }
  0x84   :  { %v86_v51 = vsel %vm70_vm4, %v62_v43, %v78_v47  ;;  %v87_v52 = vsel %vm71_vm5, %v63_v44, %v79_v48 }
  0x85   :  { %v88_v53 = vsel %vm72_vm6, %v64_v45, %v80_v49  ;;  %v89_v54 = vsel %vm73_vm7, %v65_v46, %v81_v50  ;;  %v92_v55 = vpack.c.bf16 %v87_v52, %v86_v51 }
  0x86   :  { %v93_v56 = vpack.c.bf16 %v89_v54, %v88_v53 }
  0x87   :  { %96 = vst [vmem:[%s165_s3 + $0x10] sm:$0xff] %v92_v55 }
  0x88   :  { %97 = vst [vmem:[%s165_s3 + $0x18] sm:$0xff] %v93_v56 }

// kernel: _basic_conv_forward.2
= control target key start
LH: loop header
LB: loop body
LE: loop exit
PB: predicated region body
PF: predicated region fallthrough
CT: control target
= control target key end

     0   :  { %vm244_vm0 = vcmask 293888   ;;  %s796_s0 = inlined_call_operand.vmem [shape: bf16[512,36], index: 0, kind: input, shape index: {}]   ;;  %s797_s1 = inlined_call_operand.vmem [shape: bf16[16,36], index: 1, kind: input, shape index: {}]   ;;  %s798_s2 = inlined_call_operand.vmem [shape: bf16[16,512], index: 2, kind: output, shape index: {0}]   ;;  %s799_s3 = inlined_call_operand.vmem [shape: f32[16,128], index: 3, kind: output, shape index: {1}]  }
   0x1   :  { %v598_v0 = vld [vmem:[%s796_s0 + $0x38] sm:$0xff]  ;;  %v597_v8 = vld [vmem:[%s796_s0 + $0x30] sm:$0xff]  ;;  %v596_v16 = vld [vmem:[%s796_s0 + $0x28] sm:$0xff] }
   0x2   :  { %v606_v1 = vld [vmem:[%s796_s0 + $0x78] sm:$0xff]  ;;  %v270_v4 = vsel %vm244_vm0, %v598_v0, 0  ;;  %v605_v9 = vld [vmem:[%s796_s0 + $0x70] sm:$0xff]  ;;  %v267_v12 = vsel %vm244_vm0, %v597_v8, 0  ;;  %v604_v17 = vld [vmem:[%s796_s0 + $0x68] sm:$0xff]  ;;  %v264_v20 = vsel %vm244_vm0, %v596_v16, 0 }
   0x3   :  { %v614_v2 = vld [vmem:[%s796_s0 + $0xb8] sm:$0xff]  ;;  %v294_v5 = vsel %vm244_vm0, %v606_v1, 0  ;;  %344 = vmatpush.bf16.xpose.msra.mxu0 %v270_v4  ;;  %v613_v10 = vld [vmem:[%s796_s0 + $0xb0] sm:$0xff]  ;;  %v291_v13 = vsel %vm244_vm0, %v605_v9, 0  ;;  %v612_v18 = vld [vmem:[%s796_s0 + $0xa8] sm:$0xff]  ;;  %v288_v21 = vsel %vm244_vm0, %v604_v17, 0 }
   0x4   :  { %v622_v3 = vld [vmem:[%s796_s0 + $0xf8] sm:$0xff]  ;;  %v318_v6 = vsel %vm244_vm0, %v614_v2, 0  ;;  %358 = vmatpush.bf16.xpose.msra.mxu1 %v294_v5  ;;  %v621_v11 = vld [vmem:[%s796_s0 + $0xf0] sm:$0xff]  ;;  %v315_v14 = vsel %vm244_vm0, %v613_v10, 0  ;;  %v620_v19 = vld [vmem:[%s796_s0 + $0xe8] sm:$0xff]  ;;  %v312_v22 = vsel %vm244_vm0, %v612_v18, 0 }
   0x5   :  { %v342_v7 = vsel %vm244_vm0, %v622_v3, 0  ;;  %372 = vmatpush.bf16.xpose.msra.mxu2 %v318_v6  ;;  %v339_v15 = vsel %vm244_vm0, %v621_v11, 0  ;;  %v336_v23 = vsel %vm244_vm0, %v620_v19, 0  ;;  %v595_v24 = vld [vmem:[%s796_s0 + $0x20] sm:$0xff]  ;;  %v594_v32 = vld [vmem:[%s796_s0 + $0x18] sm:$0xff]  ;;  %v593_v40 = vld [vmem:[%s796_s0 + $0x10] sm:$0xff] }
   0x6   :  { %386 = vmatpush.bf16.xpose.msra.mxu3 %v342_v7  ;;  %v603_v25 = vld [vmem:[%s796_s0 + $0x60] sm:$0xff]  ;;  %v261_v28 = vsel %vm244_vm0, %v595_v24, 0  ;;  %v602_v33 = vld [vmem:[%s796_s0 + $0x58] sm:$0xff]  ;;  %v258_v36 = vsel %vm244_vm0, %v594_v32, 0  ;;  %v601_v41 = vld [vmem:[%s796_s0 + $0x50] sm:$0xff]  ;;  %v255_v44 = vsel %vm244_vm0, %v593_v40, 0 }
   0x7   :  { %v611_v26 = vld [vmem:[%s796_s0 + $0xa0] sm:$0xff]  ;;  %v285_v29 = vsel %vm244_vm0, %v603_v25, 0  ;;  %v610_v34 = vld [vmem:[%s796_s0 + $0x98] sm:$0xff]  ;;  %v282_v37 = vsel %vm244_vm0, %v602_v33, 0  ;;  %v609_v42 = vld [vmem:[%s796_s0 + $0x90] sm:$0xff]  ;;  %v279_v45 = vsel %vm244_vm0, %v601_v41, 0  ;;  %v436_v33 = vlaneseq }
   0x8   :  { %v619_v27 = vld [vmem:[%s796_s0 + $0xe0] sm:$0xff]  ;;  %v309_v30 = vsel %vm244_vm0, %v611_v26, 0  ;;  %v618_v35 = vld [vmem:[%s796_s0 + $0xd8] sm:$0xff]  ;;  %v306_v38 = vsel %vm244_vm0, %v610_v34, 0  ;;  %v617_v43 = vld [vmem:[%s796_s0 + $0xd0] sm:$0xff]  ;;  %v303_v46 = vsel %vm244_vm0, %v609_v42, 0 }
   0x9   :  { %v333_v31 = vsel %vm244_vm0, %v619_v27, 0  ;;  %v330_v39 = vsel %vm244_vm0, %v618_v35, 0  ;;  %v327_v47 = vsel %vm244_vm0, %v617_v43, 0  ;;  %v592_v48 = vld [vmem:[%s796_s0 + $0x8] sm:$0xff]  ;;  %v591_v56 = vld [vmem:[%s796_s0] sm:$0xff]  ;;  %v437_v34 = vand.u32 127, %v436_v33 }
   0xa   :  { %v600_v49 = vld [vmem:[%s796_s0 + $0x48] sm:$0xff]  ;;  %v252_v52 = vsel %vm244_vm0, %v592_v48, 0  ;;  %v599_v57 = vld [vmem:[%s796_s0 + $0x40] sm:$0xff]  ;;  %v249_v60 = vsel %vm244_vm0, %v591_v56, 0 }
   0xb   :  { %345 = vmatpush.bf16.xpose.msra.mxu0 %v267_v12  ;;  %v608_v50 = vld [vmem:[%s796_s0 + $0x88] sm:$0xff]  ;;  %v276_v53 = vsel %vm244_vm0, %v600_v49, 0  ;;  %v607_v58 = vld [vmem:[%s796_s0 + $0x80] sm:$0xff]  ;;  %v273_v61 = vsel %vm244_vm0, %v599_v57, 0  ;;  %vm439_vm1 = vcmp.eq.s32.totalorder %v437_v34, 1  ;;  %vm438_vm2 = vcmp.eq.s32.totalorder %v437_v34, 0 }
   0xc   :  { %359 = vmatpush.bf16.xpose.msra.mxu1 %v291_v13  ;;  %v616_v51 = vld [vmem:[%s796_s0 + $0xc8] sm:$0xff]  ;;  %v300_v54 = vsel %vm244_vm0, %v608_v50, 0  ;;  %v615_v59 = vld [vmem:[%s796_s0 + $0xc0] sm:$0xff]  ;;  %v297_v62 = vsel %vm244_vm0, %v607_v58, 0 }
   0xd   :  { %373 = vmatpush.bf16.xpose.msra.mxu2 %v315_v14  ;;  %v324_v55 = vsel %vm244_vm0, %v616_v51, 0  ;;  %v321_v63 = vsel %vm244_vm0, %v615_v59, 0  ;;  %v590_v0 = vld [vmem:[%s797_s1] sm:$0xff] }
   0xe   :  { %387 = vmatpush.bf16.xpose.msra.mxu3 %v339_v15 }
  0x13   :  { %346 = vmatpush.bf16.xpose.msra.mxu0 %v264_v20 }
  0x14   :  { %360 = vmatpush.bf16.xpose.msra.mxu1 %v288_v21 }
  0x15   :  { %374 = vmatpush.bf16.xpose.msra.mxu2 %v312_v22 }
  0x16   :  { %388 = vmatpush.bf16.xpose.msra.mxu3 %v336_v23 }
  0x1b   :  { %347 = vmatpush.bf16.xpose.msra.mxu0 %v261_v28 }
  0x1c   :  { %361 = vmatpush.bf16.xpose.msra.mxu1 %v285_v29 }
  0x1d   :  { %375 = vmatpush.bf16.xpose.msra.mxu2 %v309_v30 }
  0x1e   :  { %389 = vmatpush.bf16.xpose.msra.mxu3 %v333_v31 }
  0x23   :  { %348 = vmatpush.bf16.xpose.msra.mxu0 %v258_v36 }
  0x24   :  { %362 = vmatpush.bf16.xpose.msra.mxu1 %v282_v37 }
  0x25   :  { %376 = vmatpush.bf16.xpose.msra.mxu2 %v306_v38 }
  0x26   :  { %390 = vmatpush.bf16.xpose.msra.mxu3 %v330_v39 }
  0x2b   :  { %349 = vmatpush.bf16.xpose.msra.mxu0 %v255_v44 }
  0x2c   :  { %363 = vmatpush.bf16.xpose.msra.mxu1 %v279_v45 }
  0x2d   :  { %377 = vmatpush.bf16.xpose.msra.mxu2 %v303_v46 }
  0x2e   :  { %391 = vmatpush.bf16.xpose.msra.mxu3 %v327_v47 }
  0x33   :  { %350 = vmatpush.bf16.xpose.msra.mxu0 %v252_v52 }
  0x34   :  { %364 = vmatpush.bf16.xpose.msra.mxu1 %v276_v53 }
  0x35   :  { %378 = vmatpush.bf16.xpose.msra.mxu2 %v300_v54 }
  0x36   :  { %392 = vmatpush.bf16.xpose.msra.mxu3 %v324_v55 }
  0x3b   :  { %351 = vmatpush.bf16.xpose.msra.mxu0 %v249_v60 }
  0x3c   :  { %365 = vmatpush.bf16.xpose.msra.mxu1 %v273_v61 }
  0x3d   :  { %379 = vmatpush.bf16.xpose.msra.mxu2 %v297_v62 }
  0x3e   :  { %393 = vmatpush.bf16.xpose.msra.mxu3 %v321_v63 }
  0x42   :  { %586 = vmatmul.msk.bf16.vlgmr.msra.gmra.mxu0 %vm244_vm0, %v590_v0 }
  0x43   :  { %587 = vmatmul.msk.bf16.vlgmr.msra.gmra.mxu1 %vm244_vm0, %v590_v0 }
  0x44   :  { %588 = vmatmul.msk.bf16.vlgmr.msra.gmra.mxu2 %vm244_vm0, %v590_v0 }
  0x45   :  { %589 = vmatmul.msk.bf16.vlgmr.msra.gmra.mxu3 %vm244_vm0, %v590_v0 }
  0xbf   :  { %v353_v1 = vpop.f32.mrf.mxu0 }
  0xc0   :  { %v367_v2 = vpop.f32.mrf.mxu1  ;;  %v418_v4 = vmul.f32 %v353_v1, %v353_v1 }
  0xc1   :  { %v400_v3 = vpack.c.bf16 %v367_v2, %v353_v1  ;;  %v419_v5 = vmul.f32 %v367_v2, %v367_v2  ;;  %v408_v6 = vadd.f32 %v367_v2, %v353_v1 }
  0xc3   :  { %404 = vst [vmem:[%s798_s2] sm:$0xff] %v400_v3  ;;  %v426_v7 = vadd.f32 %v419_v5, %v418_v4 }
  0xc7   :  { %v381_v8 = vpop.f32.mrf.mxu2  ;;  %v355_v12 = vpop.f32.mrf.mxu0 }
  0xc8   :  { %v395_v9 = vpop.f32.mrf.mxu3  ;;  %v420_v10 = vmul.f32 %v381_v8, %v381_v8  ;;  %v369_v13 = vpop.f32.mrf.mxu1  ;;  %v409_v14 = vadd.f32 %v408_v6, %v381_v8  ;;  %v422_v19 = vmul.f32 %v355_v12, %v355_v12 }
  0xc9   :  { %v401_v11 = vpack.c.bf16 %v395_v9, %v381_v8  ;;  %v421_v15 = vmul.f32 %v395_v9, %v395_v9  ;;  %v402_v16 = vpack.c.bf16 %v369_v13, %v355_v12  ;;  %v423_v20 = vmul.f32 %v369_v13, %v369_v13 }
  0xca   :  { %v410_v17 = vadd.f32 %v409_v14, %v395_v9  ;;  %v427_v18 = vadd.f32 %v426_v7, %v420_v10  ;;  %v413_v22 = vadd.f32 %v369_v13, %v355_v12 }
  0xcb   :  { %405 = vst [vmem:[%s798_s2 + $0x8] sm:$0xff] %v401_v11  ;;  %v431_v25 = vadd.f32 %v423_v20, %v422_v19 }
  0xcc   :  { %406 = vst [vmem:[%s798_s2 + $0x10] sm:$0xff] %v402_v16  ;;  %411 = vadd.xlane.f32.xlu1 %v410_v17  ;;  %v428_v21 = vadd.f32 %v427_v18, %v421_v15 }
  0xce   :  { %429 = vadd.xlane.f32.xlu0 %v428_v21 }
  0xcf   :  { %v383_v23 = vpop.f32.mrf.mxu2 }
  0xd0   :  { %v397_v24 = vpop.f32.mrf.mxu3  ;;  %v414_v26 = vadd.f32 %v413_v22, %v383_v23  ;;  %v424_v27 = vmul.f32 %v383_v23, %v383_v23 }
  0xd1   :  { %v403_v28 = vpack.c.bf16 %v397_v24, %v383_v23  ;;  %v425_v29 = vmul.f32 %v397_v24, %v397_v24 }
  0xd2   :  { %v415_v30 = vadd.f32 %v414_v26, %v397_v24  ;;  %v432_v31 = vadd.f32 %v431_v25, %v424_v27 }
  0xd3   :  { %407 = vst [vmem:[%s798_s2 + $0x18] sm:$0xff] %v403_v28 }
  0xd4   :  { %416 = vadd.xlane.f32.xlu1 %v415_v30  ;;  %v433_v32 = vadd.f32 %v432_v31, %v425_v29 }
  0xd6   :  { %434 = vadd.xlane.f32.xlu0 %v433_v32 }
 0x13f   :  { %v412_v35 = vpop.xlane.xlu1 %411 }
 0x141   :  { %v430_v36 = vpop.xlane.xlu0 %429 }
 0x142   :  { %v440_v37 = vsel %vm439_vm1, %v430_v36, 0.0 }
 0x143   :  { %v442_v38 = vsel %vm438_vm2, %v412_v35, %v440_v37 }
 0x144   :  { %444 = vst [vmem:[%s799_s3] sm:$0xff] %v442_v38 }
 0x147   :  { %v417_v40 = vpop.xlane.xlu1 %416 }
 0x149   :  { %v435_v39 = vpop.xlane.xlu0 %434 }
 0x14a   :  { %v441_v41 = vsel %vm439_vm1, %v435_v39, 0.0 }
 0x14b   :  { %v443_v42 = vsel %vm438_vm2, %v417_v40, %v441_v41 }
 0x14c   :  { %445 = vst [vmem:[%s799_s3 + $0x8] sm:$0xff] %v443_v42 }

</bundles_post_ra>
